<compile_context>
chip_gen: v7x
topology: tpu7x:2x2x1
jax: 0.10.0
libtpu: 0.0.40
codegen_flags: <defaults>
</compile_context>

<pallas_src>
import functools

import jax
import jax.numpy as jnp
from jax import lax
from jax.experimental import pallas as pl
from jax.experimental.pallas import tpu as pltpu

HIDDEN_SIZE = 100
INPUT_SIZE = 13
OUTPUT_SIZE = 3

# Hidden features sit on the sublane axis inside the kernel, so only a
# multiple-of-8 pad is required.
HID_PAD = 104   # 100 -> 104 (= 13 * 8)

# Contract lhs minor dim with rhs minor dim: (104,13) x (tb,13) -> (104,tb).
_NT_DIMS = (((1,), (1,)), ((), ()))


def _round_up(n, m):
    return ((n + m - 1) // m) * m


def _sigmoid(v):
    # Single EUP transcendental (tanh) instead of exp + divide.
    return 0.5 * (1.0 + jnp.tanh(0.5 * v))


def _mlp_kernel(x_ref, w1_ref, b1_ref, w2_ref, b2_ref, w3_ref, b3_ref, oT_ref):
    """Feature-major MLP tile: batch lives on the lane (last) dimension.

    x_ref  : (TB, 13)  f32  batch-major input tile
    w1_ref : (104, 13) f32      b1_ref : (104, 1) f32
    w2_ref : (104, 104) bf16    b2_ref : (104, 1) f32
    w3_ref : (3, 104)  bf16     b3_ref : (3, 1)   f32
    oT_ref : (3, TB)   f32  feature-major (lane-dense) output tile
    """
    # fc1: contract the two minor dims so the result is already feature-major
    # (batch on lanes); f32 MXU is fine here (K = 13 is tiny).
    h1 = lax.dot_general(w1_ref[...], x_ref[...], _NT_DIMS,
                         preferred_element_type=jnp.float32) + b1_ref[...]
    h1 = _sigmoid(h1)                                        # (104, TB) f32

    # fc2 on the bf16 MXU path, f32 accumulate / bias / activation.
    h2 = jnp.dot(w2_ref[...], h1.astype(jnp.bfloat16),
                 preferred_element_type=jnp.float32) + b2_ref[...]
    h2 = _sigmoid(h2)                                        # (104, TB) f32

    # fc3 logits (bf16 MXU, f32 accumulate); only the 3 real rows exist here,
    # so the log_softmax reduction never sees padded logits.
    logits = jnp.dot(w3_ref[...], h2.astype(jnp.bfloat16),
                     preferred_element_type=jnp.float32) + b3_ref[...]

    # Numerically-stable log_softmax over the 3-row feature axis (sublanes).
    m = jnp.max(logits, axis=0, keepdims=True)
    shifted = logits - m
    lse = jnp.log(jnp.sum(jnp.exp(shifted), axis=0, keepdims=True))
    oT_ref[...] = (shifted - lse).astype(oT_ref.dtype)


@functools.partial(jax.jit, static_argnames=("tile_b",))
def net_forward(x, w1, b1, w2, b2, w3, b3, *, tile_b=8192):
    """x: (B, 13) f32; weights in PyTorch layout:
       w1 (100,13), b1 (100,), w2 (100,100), b2 (100,), w3 (3,100), b3 (3,)
       Returns (B, 3) float32 log-probabilities.
    """
    B = x.shape[0]
    b_eff = _round_up(max(B, 1), 128)

    # Largest lane-aligned tile not exceeding tile_b / the batch.
    tb = min(_round_up(tile_b, 128), b_eff)
    # If one tile would cover everything but there is enough work, split into
    # >= 2 grid steps so v7x's two TensorCores both get a share.
    if tb == b_eff and b_eff >= 256:
        tb = _round_up(b_eff // 2, 128)
    B_pad = _round_up(B, tb)

    x = x.astype(jnp.float32)
    if B_pad != B:
        # Only pays an extra pass when B is not a multiple of the tile.
        x_in = jnp.pad(x, ((0, B_pad - B), (0, 0)))
    else:
        x_in = x

    # Zero-padded weights. Padded hidden rows (sigmoid(0)=0.5) never leak into
    # real outputs because the corresponding w2/w3 columns are zero.
    w1p = jnp.zeros((HID_PAD, INPUT_SIZE), jnp.float32).at[:HIDDEN_SIZE, :].set(w1)
    b1p = jnp.zeros((HID_PAD, 1), jnp.float32).at[:HIDDEN_SIZE, 0].set(b1)
    w2p = (jnp.zeros((HID_PAD, HID_PAD), jnp.float32)
           .at[:HIDDEN_SIZE, :HIDDEN_SIZE].set(w2)).astype(jnp.bfloat16)
    b2p = jnp.zeros((HID_PAD, 1), jnp.float32).at[:HIDDEN_SIZE, 0].set(b2)
    w3p = (jnp.zeros((OUTPUT_SIZE, HID_PAD), jnp.float32)
           .at[:, :HIDDEN_SIZE].set(w3)).astype(jnp.bfloat16)
    b3p = b3.reshape(OUTPUT_SIZE, 1).astype(jnp.float32)

    grid = (B_pad // tb,)

    flops = 2 * B_pad * (INPUT_SIZE * HID_PAD + HID_PAD * HID_PAD
                         + HID_PAD * OUTPUT_SIZE)
    transcendentals = B_pad * (2 * HID_PAD + OUTPUT_SIZE + 1)
    bytes_accessed = (4 * (x_in.size + w1p.size + b1p.size + b2p.size + b3p.size)
                      + 2 * (w2p.size + w3p.size)
                      + 4 * OUTPUT_SIZE * B_pad)

    outT = pl.pallas_call(
        _mlp_kernel,
        out_shape=jax.ShapeDtypeStruct((OUTPUT_SIZE, B_pad), jnp.float32),
        grid=grid,
        in_specs=[
            # Batch-tiled input; last block dim == full array dim (13), legal.
            pl.BlockSpec((tb, INPUT_SIZE), lambda i: (i, 0)),
            # Weights / biases: constant block index -> stay resident in VMEM.
            pl.BlockSpec((HID_PAD, INPUT_SIZE), lambda i: (0, 0)),
            pl.BlockSpec((HID_PAD, 1), lambda i: (0, 0)),
            pl.BlockSpec((HID_PAD, HID_PAD), lambda i: (0, 0)),
            pl.BlockSpec((HID_PAD, 1), lambda i: (0, 0)),
            pl.BlockSpec((OUTPUT_SIZE, HID_PAD), lambda i: (0, 0)),
            pl.BlockSpec((OUTPUT_SIZE, 1), lambda i: (0, 0)),
        ],
        # Feature-major output: batch on lanes -> full-width (unmasked) stores.
        out_specs=pl.BlockSpec((OUTPUT_SIZE, tb), lambda i: (0, i)),
        compiler_params=pltpu.CompilerParams(
            dimension_semantics=("parallel",),
            # ~20 MB peak at tb=8192; raise toward ~48 MiB only if the tile is
            # pushed >= ~16K lanes (v7x physical VMEM is 64 MiB).
            vmem_limit_bytes=32 * 1024 * 1024,
        ),
        cost_estimate=pl.CostEstimate(
            flops=flops,
            transcendentals=transcendentals,
            bytes_accessed=bytes_accessed,
        ),
    )(x_in, w1p, b1p, w2p, b2p, w3p, b3p)

    # Only the tiny (3, B) array is transposed back to batch-major; perf-
    # sensitive consumers can take the feature-major outT directly.
    return outT[:, :B].T


def init_params(key):
    """Uniform init matching nn.Linear's U(-1/sqrt(fan_in), 1/sqrt(fan_in)),
    in PyTorch-native (out_features, in_features) layout."""
    ks = jax.random.split(key, 6)

    def linear(kw, kb, fan_in, fan_out):
        bound = 1.0 / jnp.sqrt(jnp.float32(fan_in))
        w = jax.random.uniform(kw, (fan_out, fan_in), jnp.float32, -bound, bound)
        b = jax.random.uniform(kb, (fan_out,), jnp.float32, -bound, bound)
        return w, b

    w1, b1 = linear(ks[0], ks[1], INPUT_SIZE, HIDDEN_SIZE)
    w2, b2 = linear(ks[2], ks[3], HIDDEN_SIZE, HIDDEN_SIZE)
    w3, b3 = linear(ks[4], ks[5], HIDDEN_SIZE, OUTPUT_SIZE)
    return w1, b1, w2, b2, w3, b3


def reference_forward(x, w1, b1, w2, b2, w3, b3):
    h1 = jax.nn.sigmoid(x @ w1.T + b1)
    h2 = jax.nn.sigmoid(h1 @ w2.T + b2)
    logits = h2 @ w3.T + b3
    return jax.nn.log_softmax(logits, axis=-1)


if __name__ == "__main__":
    key = jax.random.PRNGKey(0)
    k_x, k_p = jax.random.split(key)

    batch = 8
    x = jax.random.normal(k_x, (batch, INPUT_SIZE), jnp.float32)
    params = init_params(k_p)

    out = net_forward(x, *params)
    out = jax.block_until_ready(out)

    ref = reference_forward(x, *params)
    assert out.shape == (batch, OUTPUT_SIZE), out.shape
    # fc2/fc3 use bf16 MXU operands (f32 accumulate), so tolerance is relaxed
    # relative to the pure-f32 reference.
    assert jnp.allclose(out, ref, atol=2e-2, rtol=2e-2), "mismatch vs reference"

    print("KERNEL_OK")
</pallas_src>

<mosaic_0001>
module attributes {stable_mosaic.version = 11 : i64} {
  func.func @_mlp_kernel(%arg0: i32, %arg1: memref<128x13xf32, #tpu.memory_space<vmem>>, %arg2: memref<104x13xf32, #tpu.memory_space<vmem>>, %arg3: memref<104x1xf32, #tpu.memory_space<vmem>>, %arg4: memref<104x104xbf16, #tpu.memory_space<vmem>>, %arg5: memref<104x1xf32, #tpu.memory_space<vmem>>, %arg6: memref<3x104xbf16, #tpu.memory_space<vmem>>, %arg7: memref<3x1xf32, #tpu.memory_space<vmem>>, %arg8: memref<3x128xf32, #tpu.memory_space<vmem>>) attributes {dimension_semantics = [#tpu.dimension_semantics<parallel>], iteration_bounds = array<i64: 1>, scalar_prefetch = 0 : i64, scratch_operands = 0 : i64, tpu.core_type = #tpu.core_type<tc>, window_params = [{transform_indices = @transform_0, window_bounds = array<i64: 128, 13>}, {pipeline_mode = #tpu.pipeline_mode<synchronous>, transform_indices = @transform_1, window_bounds = array<i64: 104, 13>}, {pipeline_mode = #tpu.pipeline_mode<synchronous>, transform_indices = @transform_2, window_bounds = array<i64: 104, 1>}, {pipeline_mode = #tpu.pipeline_mode<synchronous>, transform_indices = @transform_3, window_bounds = array<i64: 104, 104>}, {pipeline_mode = #tpu.pipeline_mode<synchronous>, transform_indices = @transform_4, window_bounds = array<i64: 104, 1>}, {pipeline_mode = #tpu.pipeline_mode<synchronous>, transform_indices = @transform_5, window_bounds = array<i64: 3, 104>}, {pipeline_mode = #tpu.pipeline_mode<synchronous>, transform_indices = @transform_6, window_bounds = array<i64: 3, 1>}, {transform_indices = @transform_7, window_bounds = array<i64: 3, 128>}]} {
    %c0 = arith.constant 0 : index
    %c0_0 = arith.constant 0 : index
    %0 = vector.load %arg2[%c0, %c0_0] : memref<104x13xf32, #tpu.memory_space<vmem>>, vector<104x13xf32>
    %c0_1 = arith.constant 0 : index
    %c0_2 = arith.constant 0 : index
    %1 = vector.load %arg1[%c0_1, %c0_2] : memref<128x13xf32, #tpu.memory_space<vmem>>, vector<128x13xf32>
    %cst = arith.constant dense<0.000000e+00> : vector<104x128xf32>
    %2 = tpu.matmul %0, %1, %cst {dimension_numbers = #tpu.dot_dimension_numbers<[1], [1], [0], [0], [0, 0, 1, 0], [], []>} : vector<104x13xf32>, vector<128x13xf32>, vector<104x128xf32> -> vector<104x128xf32>
    %c0_3 = arith.constant 0 : index
    %c0_4 = arith.constant 0 : index
    %3 = vector.load %arg3[%c0_3, %c0_4] : memref<104x1xf32, #tpu.memory_space<vmem>>, vector<104x1xf32>
    %4 = vector.broadcast %3 : vector<104x1xf32> to vector<104x128xf32>
    %5 = arith.addf %2, %4 : vector<104x128xf32>
    %cst_5 = arith.constant 5.000000e-01 : f32
    %6 = vector.broadcast %cst_5 : f32 to vector<104x128xf32>
    %7 = arith.mulf %6, %5 : vector<104x128xf32>
    %8 = math.tanh %7 : vector<104x128xf32>
    %cst_6 = arith.constant 1.000000e+00 : f32
    %9 = vector.broadcast %cst_6 : f32 to vector<104x128xf32>
    %10 = arith.addf %9, %8 : vector<104x128xf32>
    %cst_7 = arith.constant 5.000000e-01 : f32
    %11 = vector.broadcast %cst_7 : f32 to vector<104x128xf32>
    %12 = arith.mulf %11, %10 : vector<104x128xf32>
    %c0_8 = arith.constant 0 : index
    %c0_9 = arith.constant 0 : index
    %13 = vector.load %arg4[%c0_8, %c0_9] : memref<104x104xbf16, #tpu.memory_space<vmem>>, vector<104x104xbf16>
    %14 = arith.truncf %12 : vector<104x128xf32> to vector<104x128xbf16>
    %cst_10 = arith.constant dense<0.000000e+00> : vector<104x128xf32>
    %15 = tpu.matmul %13, %14, %cst_10 {dimension_numbers = #tpu.dot_dimension_numbers<[1], [0], [0], [1], [0, 0, 1, 1], [], []>} : vector<104x104xbf16>, vector<104x128xbf16>, vector<104x128xf32> -> vector<104x128xf32>
    %c0_11 = arith.constant 0 : index
    %c0_12 = arith.constant 0 : index
    %16 = vector.load %arg5[%c0_11, %c0_12] : memref<104x1xf32, #tpu.memory_space<vmem>>, vector<104x1xf32>
    %17 = vector.broadcast %16 : vector<104x1xf32> to vector<104x128xf32>
    %18 = arith.addf %15, %17 : vector<104x128xf32>
    %cst_13 = arith.constant 5.000000e-01 : f32
    %19 = vector.broadcast %cst_13 : f32 to vector<104x128xf32>
    %20 = arith.mulf %19, %18 : vector<104x128xf32>
    %21 = math.tanh %20 : vector<104x128xf32>
    %cst_14 = arith.constant 1.000000e+00 : f32
    %22 = vector.broadcast %cst_14 : f32 to vector<104x128xf32>
    %23 = arith.addf %22, %21 : vector<104x128xf32>
    %cst_15 = arith.constant 5.000000e-01 : f32
    %24 = vector.broadcast %cst_15 : f32 to vector<104x128xf32>
    %25 = arith.mulf %24, %23 : vector<104x128xf32>
    %c0_16 = arith.constant 0 : index
    %c0_17 = arith.constant 0 : index
    %26 = vector.load %arg6[%c0_16, %c0_17] : memref<3x104xbf16, #tpu.memory_space<vmem>>, vector<3x104xbf16>
    %27 = arith.truncf %25 : vector<104x128xf32> to vector<104x128xbf16>
    %cst_18 = arith.constant dense<0.000000e+00> : vector<3x128xf32>
    %28 = tpu.matmul %26, %27, %cst_18 {dimension_numbers = #tpu.dot_dimension_numbers<[1], [0], [0], [1], [0, 0, 1, 1], [], []>} : vector<3x104xbf16>, vector<104x128xbf16>, vector<3x128xf32> -> vector<3x128xf32>
    %c0_19 = arith.constant 0 : index
    %c0_20 = arith.constant 0 : index
    %29 = vector.load %arg7[%c0_19, %c0_20] : memref<3x1xf32, #tpu.memory_space<vmem>>, vector<3x1xf32>
    %30 = vector.broadcast %29 : vector<3x1xf32> to vector<3x128xf32>
    %31 = arith.addf %28, %30 : vector<3x128xf32>
    %cst_21 = arith.constant dense<0xFF800000> : vector<128xf32>
    %32 = vector.multi_reduction <maximumf>, %31, %cst_21 [0] : vector<3x128xf32> to vector<128xf32>
    %33 = vector.shape_cast %32 : vector<128xf32> to vector<1x128xf32>
    %34 = vector.broadcast %33 : vector<1x128xf32> to vector<3x128xf32>
    %35 = arith.subf %31, %34 : vector<3x128xf32>
    %36 = math.exp %35 : vector<3x128xf32>
    %cst_22 = arith.constant dense<0.000000e+00> : vector<128xf32>
    %37 = vector.multi_reduction <add>, %36, %cst_22 [0] : vector<3x128xf32> to vector<128xf32>
    %38 = vector.shape_cast %37 : vector<128xf32> to vector<1x128xf32>
    %39 = math.log %38 : vector<1x128xf32>
    %40 = vector.broadcast %39 : vector<1x128xf32> to vector<3x128xf32>
    %41 = arith.subf %35, %40 : vector<3x128xf32>
    %c0_23 = arith.constant 0 : index
    %c0_24 = arith.constant 0 : index
    %42 = vector.load %arg8[%c0_23, %c0_24] : memref<3x128xf32, #tpu.memory_space<vmem>>, vector<3x128xf32>
    tpu.vector_store %arg8[%c0_23, %c0_24], %41 {strides = array<i32>} : memref<3x128xf32, #tpu.memory_space<vmem>>, vector<3x128xf32>,
    return
  }
  func.func @transform_0(%arg0: i32) -> (i32, i32) {
    %c0_i32 = arith.constant 0 : i32
    %c0_i32_0 = arith.constant 0 : i32
    return %arg0, %c0_i32 : i32, i32
  }
  func.func @transform_1(%arg0: i32) -> (i32, i32) {
    %c0_i32 = arith.constant 0 : i32
    %c0_i32_0 = arith.constant 0 : i32
    %c0_i32_1 = arith.constant 0 : i32
    return %c0_i32, %c0_i32_0 : i32, i32
  }
  func.func @transform_2(%arg0: i32) -> (i32, i32) {
    %c0_i32 = arith.constant 0 : i32
    %c0_i32_0 = arith.constant 0 : i32
    %c0_i32_1 = arith.constant 0 : i32
    return %c0_i32, %c0_i32_0 : i32, i32
  }
  func.func @transform_3(%arg0: i32) -> (i32, i32) {
    %c0_i32 = arith.constant 0 : i32
    %c0_i32_0 = arith.constant 0 : i32
    %c0_i32_1 = arith.constant 0 : i32
    return %c0_i32, %c0_i32_0 : i32, i32
  }
  func.func @transform_4(%arg0: i32) -> (i32, i32) {
    %c0_i32 = arith.constant 0 : i32
    %c0_i32_0 = arith.constant 0 : i32
    %c0_i32_1 = arith.constant 0 : i32
    return %c0_i32, %c0_i32_0 : i32, i32
  }
  func.func @transform_5(%arg0: i32) -> (i32, i32) {
    %c0_i32 = arith.constant 0 : i32
    %c0_i32_0 = arith.constant 0 : i32
    %c0_i32_1 = arith.constant 0 : i32
    return %c0_i32, %c0_i32_0 : i32, i32
  }
  func.func @transform_6(%arg0: i32) -> (i32, i32) {
    %c0_i32 = arith.constant 0 : i32
    %c0_i32_0 = arith.constant 0 : i32
    %c0_i32_1 = arith.constant 0 : i32
    return %c0_i32, %c0_i32_0 : i32, i32
  }
  func.func @transform_7(%arg0: i32) -> (i32, i32) {
    %c0_i32 = arith.constant 0 : i32
    %c0_i32_0 = arith.constant 0 : i32
    return %c0_i32, %arg0 : i32, i32
  }
}

</mosaic_0001>

<bundles_post_ra>
// kernel: net_forward.1
= control target key start
LH: loop header
LB: loop body
LE: loop exit
PB: predicated region body
PF: predicated region fallthrough
CT: control target
= control target key end

     0   :  { %vm134_vm0 = vcmask 105472   ;;  %v1114_v0 = vmov 0.0|0.0   ;;  %vm1115_vm2 = vmmov 0   ;;  %v1116_v4 = vmov 0.0   ;;  %s1464_s0 = inlined_call_operand.vmem [shape: f32[128,13], index: 0, kind: input, shape index: {}]   ;;  %s1465_s2 = inlined_call_operand.vmem [shape: f32[104,1], index: 2, kind: input, shape index: {}]   ;;  %s1466_s4 = inlined_call_operand.vmem [shape: f32[104,1], index: 4, kind: input, shape index: {}]   ;;  %s1467_s6 = inlined_call_operand.vmem [shape: f32[3,1], index: 6, kind: input, shape index: {}]   ;;  %s1468_s1 = inlined_call_operand.vmem [shape: f32[104,13], index: 1, kind: input, shape index: {}]   ;;  %s1469_s3 = inlined_call_operand.vmem [shape: bf16[104,104], index: 3, kind: input, shape index: {}]   ;;  %s1470_s5 = inlined_call_operand.vmem [shape: bf16[3,104], index: 5, kind: input, shape index: {}]   ;;  %s1471_s7 = inlined_call_operand.vmem [shape: f32[3,128], index: 7, kind: output, shape index: {}]  }
   0x1   :  { %1013 = vmatprep.subr.bf16.mxu0 %v1114_v0  ;;  %v40_v1 = vld [vmem:[%s1464_s0] sm:$0xff]  ;;  %v41_v2 = vld [vmem:[%s1464_s0 + $0x8] sm:$0xff]  ;;  %vm1167_vm1 = vmpackc.low %vm134_vm0, %vm134_vm0  ;;  %914 = vmatprep.mubr.msk.f32.mxu0 %vm1115_vm2, %v1116_v4  ;;  %v1117_v6 = vmov 0   ;;  %vm557_vm3 = vcmask 1043456   ;;  %vm535_vm4 = vcmask 850944   ;;  %vm761_vm5 = vcmask 1042432  }
   0x2   :  { %v1014_v5 = vpack.c.bf16 %v41_v2, %v40_v1  ;;  %1049 = vset.pattern.permute.xlu0 %v1117_v6  ;;  %1050 = vset.pattern.permute.xlu1 %v1117_v6  ;;  %v42_v7 = vld [vmem:[%s1464_s0 + $0x10] sm:$0xff]  ;;  %v43_v8 = vld [vmem:[%s1464_s0 + $0x18] sm:$0xff]  ;;  %v56_v10 = vld [vmem:[%s1465_s2] sm:$0xff] }
   0x3   :  { %953 = vmatprep.subr.bf16.mxu1 %v1116_v4  ;;  %967 = vmatprep.mubr.msk.bf16.mxu1 %vm1115_vm2, %v1116_v4  ;;  %v1018_v9 = vpack.c.bf16 %v43_v8, %v42_v7  ;;  %v58_v11 = vld [vmem:[%s1465_s2 + $0x10] sm:$0xff]  ;;  %v44_v12 = vld [vmem:[%s1464_s0 + $0x20] sm:$0xff]  ;;  %v45_v13 = vld [vmem:[%s1464_s0 + $0x28] sm:$0xff] }
   0x4   :  { %1016 = vmatpush3.bf16.xpose.msk.msra.mxu0 %vm1167_vm1, %v1014_v5  ;;  %71 = vperm.xlu0 %1049, %v56_v10   ;;  %v57_v14 = vld [vmem:[%s1465_s2 + $0x8] sm:$0xff]  ;;  %v59_v15 = vld [vmem:[%s1465_s2 + $0x18] sm:$0xff]  ;;  %v1022_v16 = vpack.c.bf16 %v45_v13, %v44_v12  ;;  %v60_v17 = vld [vmem:[%s1465_s2 + $0x20] sm:$0xff] }
   0x5   :  { %1017 = vmatprep.subr.bf16.mxu0 %v1114_v0  ;;  %81 = vperm.xlu1 %1050, %v58_v11   ;;  %v61_v18 = vld [vmem:[%s1465_s2 + $0x28] sm:$0xff]  ;;  %v46_v19 = vld [vmem:[%s1464_s0 + $0x30] sm:$0xff]  ;;  %v47_v20 = vld [vmem:[%s1464_s0 + $0x38] sm:$0xff] }
   0x6   :  { %v62_v21 = vld [vmem:[%s1465_s2 + $0x30] sm:$0xff]  ;;  %v63_v22 = vld [vmem:[%s1465_s2 + $0x38] sm:$0xff]  ;;  %v1026_v23 = vpack.c.bf16 %v47_v20, %v46_v19  ;;  %v64_v24 = vld [vmem:[%s1465_s2 + $0x40] sm:$0xff] }
   0x7   :  { %v65_v25 = vld [vmem:[%s1465_s2 + $0x48] sm:$0xff]  ;;  %v48_v26 = vld [vmem:[%s1464_s0 + $0x40] sm:$0xff]  ;;  %v66_v28 = vld [vmem:[%s1465_s2 + $0x50] sm:$0xff] }
   0x8   :  { %76 = vperm.xlu0 %1049, %v57_v14   ;;  %v49_v27 = vld [vmem:[%s1464_s0 + $0x48] sm:$0xff]  ;;  %v67_v29 = vld [vmem:[%s1465_s2 + $0x58] sm:$0xff]  ;;  %v68_v31 = vld [vmem:[%s1465_s2 + $0x60] sm:$0xff] }
   0x9   :  { %86 = vperm.xlu1 %1050, %v59_v15   ;;  %v1030_v30 = vpack.c.bf16 %v49_v27, %v48_v26  ;;  %v424_v32 = vld [vmem:[%s1466_s4] sm:$0xff]  ;;  %v50_v33 = vld [vmem:[%s1464_s0 + $0x50] sm:$0xff]  ;;  %v51_v34 = vld [vmem:[%s1464_s0 + $0x58] sm:$0xff] }
   0xa   :  { %v425_v35 = vld [vmem:[%s1466_s4 + $0x8] sm:$0xff]  ;;  %v426_v36 = vld [vmem:[%s1466_s4 + $0x10] sm:$0xff]  ;;  %v1034_v37 = vpack.c.bf16 %v51_v34, %v50_v33  ;;  %v427_v38 = vld [vmem:[%s1466_s4 + $0x18] sm:$0xff] }
   0xb   :  { %v428_v39 = vld [vmem:[%s1466_s4 + $0x20] sm:$0xff]  ;;  %v53_v41 = vld [vmem:[%s1464_s0 + $0x68] sm:$0xff]  ;;  %v430_v43 = vld [vmem:[%s1466_s4 + $0x30] sm:$0xff] }
   0xc   :  { %1020 = vmatpush3.bf16.xpose.msk.msra.mxu0 %vm1167_vm1, %v1018_v9  ;;  %91 = vperm.xlu0 %1049, %v60_v17   ;;  %v52_v40 = vld [vmem:[%s1464_s0 + $0x60] sm:$0xff]  ;;  %v429_v42 = vld [vmem:[%s1466_s4 + $0x28] sm:$0xff]  ;;  %v431_v45 = vld [vmem:[%s1466_s4 + $0x38] sm:$0xff] }
   0xd   :  { %1021 = vmatprep.subr.bf16.mxu0 %v1114_v0  ;;  %96 = vperm.xlu1 %1050, %v61_v18   ;;  %v1038_v44 = vpack.c.bf16 %v53_v41, %v52_v40  ;;  %v432_v46 = vld [vmem:[%s1466_s4 + $0x40] sm:$0xff]  ;;  %v54_v47 = vld [vmem:[%s1464_s0 + $0x70] sm:$0xff]  ;;  %v55_v48 = vld [vmem:[%s1464_s0 + $0x78] sm:$0xff] }
   0xe   :  { %v433_v49 = vld [vmem:[%s1466_s4 + $0x48] sm:$0xff]  ;;  %v434_v50 = vld [vmem:[%s1466_s4 + $0x50] sm:$0xff]  ;;  %v1042_v51 = vpack.c.bf16 %v55_v48, %v54_v47  ;;  %v435_v52 = vld [vmem:[%s1466_s4 + $0x58] sm:$0xff] }
   0xf   :  { %v436_v53 = vld [vmem:[%s1466_s4 + $0x60] sm:$0xff]  ;;  %v28_v56 = vld [vmem:[%s1468_s1 + $0x8] sm:$0xff]  ;;  %v29_v57 = vld [vmem:[%s1468_s1 + $0x10] sm:$0xff] }
  0x10   :  { %101 = vperm.xlu0 %1049, %v62_v21   ;;  %v709_v54 = vld [vmem:[%s1467_s6] sm:$0x7]  ;;  %v30_v58 = vld [vmem:[%s1468_s1 + $0x18] sm:$0xff]  ;;  %v32_v60 = vld [vmem:[%s1468_s1 + $0x28] sm:$0xff] }
  0x11   :  { %106 = vperm.xlu1 %1050, %v63_v22   ;;  %v27_v55 = vld [vmem:[%s1468_s1] sm:$0xff]  ;;  %v33_v61 = vld [vmem:[%s1468_s1 + $0x30] sm:$0xff]  ;;  %v34_v62 = vld [vmem:[%s1468_s1 + $0x38] sm:$0xff] }
  0x12   :  { %v31_v59 = vld [vmem:[%s1468_s1 + $0x20] sm:$0xff]  ;;  %v37_v1 = vld [vmem:[%s1468_s1 + $0x50] sm:$0xff]  ;;  %v38_v2 = vld [vmem:[%s1468_s1 + $0x58] sm:$0xff] }
  0x13   :  { %v35_v63 = vld [vmem:[%s1468_s1 + $0x40] sm:$0xff] }
  0x14   :  { %1024 = vmatpush3.bf16.xpose.msk.msra.mxu0 %vm1167_vm1, %v1022_v16  ;;  %111 = vperm.xlu0 %1049, %v64_v24   ;;  %v39_v3 = vld [vmem:[%s1468_s1 + $0x60] sm:$0xff] }
  0x15   :  { %1025 = vmatprep.subr.bf16.mxu0 %v1114_v0  ;;  %116 = vperm.xlu1 %1050, %v65_v25  }
  0x18   :  { %121 = vperm.xlu0 %1049, %v66_v28  }
  0x19   :  { %126 = vperm.xlu1 %1050, %v67_v29  }
  0x1c   :  { %1028 = vmatpush3.bf16.xpose.msk.msra.mxu0 %vm1167_vm1, %v1026_v23  ;;  %131 = vperm.xlu0 %1049, %v68_v31  }
  0x1d   :  { %1029 = vmatprep.subr.bf16.mxu0 %v1114_v0  ;;  %439 = vperm.xlu1 %1050, %v424_v32  }
  0x20   :  { %444 = vperm.xlu0 %1049, %v425_v35  }
  0x21   :  { %449 = vperm.xlu1 %1050, %v426_v36  }
  0x24   :  { %1032 = vmatpush3.bf16.xpose.msk.msra.mxu0 %vm1167_vm1, %v1030_v30  ;;  %454 = vperm.xlu0 %1049, %v427_v38  }
  0x25   :  { %1033 = vmatprep.subr.bf16.mxu0 %v1114_v0  ;;  %459 = vperm.xlu1 %1050, %v428_v39  }
  0x28   :  { %464 = vperm.xlu0 %1049, %v429_v42  }
  0x29   :  { %469 = vperm.xlu1 %1050, %v430_v43  }
  0x2c   :  { %1036 = vmatpush3.bf16.xpose.msk.msra.mxu0 %vm1167_vm1, %v1034_v37  ;;  %474 = vperm.xlu0 %1049, %v431_v45  }
  0x2d   :  { %1037 = vmatprep.subr.bf16.mxu0 %v1114_v0  ;;  %479 = vperm.xlu1 %1050, %v432_v46  }
  0x30   :  { %484 = vperm.xlu0 %1049, %v433_v49  }
  0x31   :  { %489 = vperm.xlu1 %1050, %v434_v50  }
  0x34   :  { %1040 = vmatpush3.bf16.xpose.msk.msra.mxu0 %vm1167_vm1, %v1038_v44  ;;  %494 = vperm.xlu0 %1049, %v435_v52  }
  0x35   :  { %1041 = vmatprep.subr.bf16.mxu0 %v1114_v0  ;;  %499 = vperm.xlu1 %1050, %v436_v53   ;;  %v36_v0 = vld [vmem:[%s1468_s1 + $0x48] sm:$0xff] }
  0x38   :  { %712 = vperm.xlu0 %1049, %v709_v54  }
  0x3c   :  { %1044 = vmatpush3.bf16.xpose.msk.msra.mxu0 %vm1167_vm1, %v1042_v51 }
  0x43   :  { %915 = vmatmul.mubr.msk.f32.vlgmr.msra.gmra.mrb[0].mxu0 %vm134_vm0, %v27_v55 }
  0x44   :  { %917 = vmatprep.mubr.msk.f32.mxu0 %vm1115_vm2, %v1116_v4 }
  0x47   :  { %918 = vmatmul.mubr.msk.f32.gmra.mrb[2].mxu0 %vm134_vm0, %v28_v56 }
  0x48   :  { %920 = vmatprep.mubr.msk.f32.mxu0 %vm1115_vm2, %v1116_v4 }
  0x4b   :  { %921 = vmatmul.mubr.msk.f32.gmra.mrb[4].mxu0 %vm134_vm0, %v29_v57 }
  0x4c   :  { %923 = vmatprep.mubr.msk.f32.mxu0 %vm1115_vm2, %v1116_v4 }
  0x4f   :  { %924 = vmatmul.mubr.msk.f32.gmra.mrb[6].mxu0 %vm134_vm0, %v30_v58 }
  0x50   :  { %926 = vmatprep.mubr.msk.f32.mxu0 %vm1115_vm2, %v1116_v4 }
  0x53   :  { %927 = vmatmul.mubr.msk.f32.gmra.mrb[8].mxu0 %vm134_vm0, %v31_v59 }
  0x54   :  { %929 = vmatprep.mubr.msk.f32.mxu0 %vm1115_vm2, %v1116_v4 }
  0x57   :  { %930 = vmatmul.mubr.msk.f32.gmra.mrb[10].mxu0 %vm134_vm0, %v32_v60 }
  0x58   :  { %932 = vmatprep.mubr.msk.f32.mxu0 %vm1115_vm2, %v1116_v4 }
  0x5b   :  { %933 = vmatmul.mubr.msk.f32.gmra.mrb[12].mxu0 %vm134_vm0, %v33_v61 }
  0x5c   :  { %935 = vmatprep.mubr.msk.f32.mxu0 %vm1115_vm2, %v1116_v4 }
  0x5f   :  { %936 = vmatmul.mubr.msk.f32.gmra.mrb[14].mxu0 %vm134_vm0, %v34_v62 }
  0x60   :  { %938 = vmatprep.mubr.msk.f32.mxu0 %vm1115_vm2, %v1116_v4 }
  0x63   :  { %939 = vmatmul.mubr.msk.f32.gmra.mrb[16].mxu0 %vm134_vm0, %v35_v63 }
  0x64   :  { %941 = vmatprep.mubr.msk.f32.mxu0 %vm1115_vm2, %v1116_v4 }
  0x67   :  { %942 = vmatmul.mubr.msk.f32.gmra.mrb[18].mxu0 %vm134_vm0, %v36_v0 }
  0x68   :  { %944 = vmatprep.mubr.msk.f32.mxu0 %vm1115_vm2, %v1116_v4 }
  0x6b   :  { %945 = vmatmul.mubr.msk.f32.gmra.mrb[20].mxu0 %vm134_vm0, %v37_v1 }
  0x6c   :  { %947 = vmatprep.mubr.msk.f32.mxu0 %vm1115_vm2, %v1116_v4 }
  0x6f   :  { %948 = vmatmul.mubr.msk.f32.gmra.mrb[22].mxu0 %vm134_vm0, %v38_v2 }
  0x70   :  { %950 = vmatprep.mubr.msk.f32.mxu0 %vm1115_vm2, %v1116_v4 }
  0x73   :  { %951 = vmatmul.mubr.msk.f32.gmra.mrb[24].mxu0 %vm134_vm0, %v39_v3 }
  0x83   :  { %v72_v5 = vpop.permute.xlu0 %71 }
  0x84   :  { %v82_v14 = vpop.permute.xlu1 %81 }
  0x87   :  { %v77_v10 = vpop.permute.xlu0 %76 }
  0x88   :  { %v87_v20 = vpop.permute.xlu1 %86 }
  0x8b   :  { %v92_v26 = vpop.permute.xlu0 %91 }
  0x8c   :  { %v97_v33 = vpop.permute.xlu1 %96 }
  0x8f   :  { %v102_v42 = vpop.permute.xlu0 %101 }
  0x90   :  { %v107_v50 = vpop.permute.xlu1 %106 }
  0x93   :  { %v112_v59 = vpop.permute.xlu0 %111 }
  0x94   :  { %v117_v3 = vpop.permute.xlu1 %116 }
 0x116   :  { %v288_v6 = vpop.f32.mrb[0].mxu0 }
 0x117   :  { %v289_v7 = vadd.f32 %v288_v6, %v72_v5  ;;  %v916_v8 = vpop.f32.mrb[1].mxu0 }
 0x119   :  { %v352_v9 = vmul.f32 0.5, %v289_v7 }
 0x11a   :  { %v293_v11 = vpop.f32.mrb[2].mxu0 }
 0x11b   :  { %1058 = vtanh.f32 %v352_v9  ;;  %v294_v12 = vadd.f32 %v293_v11, %v77_v10  ;;  %v919_v13 = vpop.f32.mrb[3].mxu0 }
 0x11c   :  { %v122_v13 = vpop.permute.xlu0 %121 }
 0x11d   :  { %v353_v15 = vmul.f32 0.5, %v294_v12 }
 0x11e   :  { %v298_v16 = vpop.f32.mrb[4].mxu0 }
 0x11f   :  { %1060 = vtanh.f32 %v353_v15  ;;  %v299_v17 = vadd.f32 %v298_v16, %v82_v14  ;;  %v922_v18 = vpop.f32.mrb[5].mxu0 }
 0x121   :  { %v354_v19 = vmul.f32 0.5, %v299_v17 }
 0x122   :  { %v303_v21 = vpop.f32.mrb[6].mxu0 }
 0x123   :  { %1062 = vtanh.f32 %v354_v19  ;;  %v304_v22 = vadd.f32 %v303_v21, %v87_v20  ;;  %v925_v23 = vpop.f32.mrb[7].mxu0  ;;  %v127_v21 = vpop.permute.xlu1 %126 }
 0x125   :  { %v1059_v24 = vpop.eup %1058  ;;  %v355_v25 = vmul.f32 0.5, %v304_v22 }
 0x126   :  { %v308_v27 = vpop.f32.mrb[8].mxu0  ;;  %v378_v30 = vadd.f32 1.0, %v1059_v24 }
 0x127   :  { %1064 = vtanh.f32 %v355_v25  ;;  %v309_v28 = vadd.f32 %v308_v27, %v92_v26  ;;  %v928_v29 = vpop.f32.mrb[9].mxu0 }
 0x128   :  { %v391_v38 = vmul.f32 0.5, %v378_v30  ;;  %v132_v30 = vpop.permute.xlu0 %131 }
 0x129   :  { %v1061_v31 = vpop.eup %1060  ;;  %v356_v32 = vmul.f32 0.5, %v309_v28 }
 0x12a   :  { %v313_v34 = vpop.f32.mrb[10].mxu0  ;;  %v379_v35 = vadd.f32 1.0, %v1061_v31 }
 0x12b   :  { %1066 = vtanh.f32 %v356_v32  ;;  %v314_v36 = vadd.f32 %v313_v34, %v97_v33  ;;  %v931_v37 = vpop.f32.mrb[11].mxu0 }
 0x12c   :  { %v392_v39 = vmul.f32 0.5, %v379_v35 }
 0x12d   :  { %v1063_v40 = vpop.eup %1062  ;;  %v357_v41 = vmul.f32 0.5, %v314_v36 }
 0x12e   :  { %v318_v43 = vpop.f32.mrb[12].mxu0  ;;  %v417_v44 = vpack.c.bf16 %v392_v39, %v391_v38  ;;  %v380_v47 = vadd.f32 1.0, %v1063_v40 }
 0x12f   :  { %1068 = vtanh.f32 %v357_v41  ;;  %v319_v45 = vadd.f32 %v318_v43, %v102_v42  ;;  %v934_v46 = vpop.f32.mrb[13].mxu0 }
 0x130   :  { %954 = vmatpush3.bf16.msra.mxu1 %v417_v44  ;;  %v393_v55 = vmul.f32 0.5, %v380_v47 }
 0x131   :  { %v1065_v48 = vpop.eup %1064  ;;  %v358_v49 = vmul.f32 0.5, %v319_v45  ;;  %955 = vmatprep.subr.bf16.mxu1 %v1116_v4 }
 0x132   :  { %v381_v51 = vadd.f32 1.0, %v1065_v48  ;;  %v323_v52 = vpop.f32.mrb[14].mxu0 }
 0x133   :  { %1070 = vtanh.f32 %v358_v49  ;;  %v324_v53 = vadd.f32 %v323_v52, %v107_v50  ;;  %v937_v54 = vpop.f32.mrb[15].mxu0 }
 0x134   :  { %v394_v56 = vmul.f32 0.5, %v381_v51  ;;  %v1051_v54 = vld [vmem:[%s1469_s3] sm:$0xff]  }
 0x135   :  { %v1067_v57 = vpop.eup %1066  ;;  %v359_v58 = vmul.f32 0.5, %v324_v53 }
 0x136   :  { %v328_v60 = vpop.f32.mrb[16].mxu0  ;;  %v418_v61 = vpack.c.bf16 %v394_v56, %v393_v55  ;;  %v382_v0 = vadd.f32 1.0, %v1067_v57  ;;  %v1052_v55 = vld [vmem:[%s1469_s3 + $0x8] sm:$0xff]   ;;  %v1053_v56 = vld [vmem:[%s1469_s3 + $0x10] sm:$0xff]   ;;  %v1054_v57 = vld [vmem:[%s1469_s3 + $0x18] sm:$0xff]  }
 0x137   :  { %1072 = vtanh.f32 %v359_v58  ;;  %v329_v62 = vadd.f32 %v328_v60, %v112_v59  ;;  %v940_v63 = vpop.f32.mrb[17].mxu0  ;;  %v1055_v58 = vld [vmem:[%s1469_s3 + $0x20] sm:$0xff]   ;;  %v1056_v59 = vld [vmem:[%s1469_s3 + $0x28] sm:$0xff]   ;;  %v1057_v60 = vld [vmem:[%s1469_s3 + $0x30] ss:$0 sps:$4 sm:$0xff]  }
 0x138   :  { %956 = vmatpush3.bf16.msra.mxu1 %v418_v61  ;;  %v395_v9 = vmul.f32 0.5, %v382_v0  ;;  %v440_v61 = vpop.permute.xlu1 %439 }
 0x139   :  { %v1069_v1 = vpop.eup %1068  ;;  %v360_v2 = vmul.f32 0.5, %v329_v62  ;;  %957 = vmatprep.subr.bf16.mxu1 %v1116_v4 }
 0x13a   :  { %v383_v5 = vadd.f32 1.0, %v1069_v1  ;;  %v333_v6 = vpop.f32.mrb[18].mxu0  ;;  %v445_v1 = vpop.permute.xlu0 %444 }
 0x13b   :  { %1074 = vtanh.f32 %v360_v2  ;;  %v334_v7 = vadd.f32 %v333_v6, %v117_v3  ;;  %v943_v8 = vpop.f32.mrb[19].mxu0 }
 0x13c   :  { %v396_v10 = vmul.f32 0.5, %v383_v5  ;;  %v450_v8 = vpop.permute.xlu1 %449 }
 0x13d   :  { %v1071_v11 = vpop.eup %1070  ;;  %v361_v12 = vmul.f32 0.5, %v334_v7 }
 0x13e   :  { %v338_v14 = vpop.f32.mrb[20].mxu0  ;;  %v419_v15 = vpack.c.bf16 %v396_v10, %v395_v9  ;;  %v384_v18 = vadd.f32 1.0, %v1071_v11 }
 0x13f   :  { %1076 = vtanh.f32 %v361_v12  ;;  %v339_v16 = vadd.f32 %v338_v14, %v122_v13  ;;  %v946_v17 = vpop.f32.mrb[21].mxu0  ;;  %v455_v12 = vpop.permute.xlu0 %454 }
 0x140   :  { %958 = vmatpush3.bf16.msra.mxu1 %v419_v15  ;;  %v397_v26 = vmul.f32 0.5, %v384_v18 }
 0x141   :  { %v1073_v19 = vpop.eup %1072  ;;  %v362_v20 = vmul.f32 0.5, %v339_v16  ;;  %959 = vmatprep.subr.bf16.mxu1 %v1116_v4 }
 0x142   :  { %v385_v22 = vadd.f32 1.0, %v1073_v19  ;;  %v343_v23 = vpop.f32.mrb[22].mxu0  ;;  %v460_v19 = vpop.permute.xlu1 %459 }
 0x143   :  { %1078 = vtanh.f32 %v362_v20  ;;  %v344_v24 = vadd.f32 %v343_v23, %v127_v21  ;;  %v949_v25 = vpop.f32.mrb[23].mxu0 }
 0x144   :  { %v398_v27 = vmul.f32 0.5, %v385_v22  ;;  %v465_v25 = vpop.permute.xlu0 %464 }
 0x145   :  { %v1075_v28 = vpop.eup %1074  ;;  %v363_v29 = vmul.f32 0.5, %v344_v24 }
 0x146   :  { %v348_v31 = vpop.f32.mrb[24].mxu0  ;;  %v420_v32 = vpack.c.bf16 %v398_v27, %v397_v26  ;;  %v386_v35 = vadd.f32 1.0, %v1075_v28 }
 0x147   :  { %1080 = vtanh.f32 %v363_v29  ;;  %v349_v33 = vadd.f32 %v348_v31, %v132_v30  ;;  %v952_v34 = vpop.f32.mrb[25].mxu0 }
 0x148   :  { %960 = vmatpush3.bf16.msra.mxu1 %v420_v32  ;;  %v399_v39 = vmul.f32 0.5, %v386_v35 }
 0x149   :  { %v1077_v36 = vpop.eup %1076  ;;  %v364_v37 = vmul.f32 0.5, %v349_v33  ;;  %961 = vmatprep.subr.bf16.mxu1 %v1116_v4 }
 0x14a   :  { %v387_v38 = vadd.f32 1.0, %v1077_v36  ;;  %v470_v36 = vpop.permute.xlu1 %469 }
 0x14b   :  { %1082 = vtanh.f32 %v364_v37 }
 0x14c   :  { %v400_v40 = vmul.f32 0.5, %v387_v38 }
 0x14d   :  { %v1079_v41 = vpop.eup %1078 }
 0x14e   :  { %v421_v42 = vpack.c.bf16 %v400_v40, %v399_v39  ;;  %v388_v43 = vadd.f32 1.0, %v1079_v41 }
 0x150   :  { %962 = vmatpush3.bf16.msra.mxu1 %v421_v42  ;;  %v401_v46 = vmul.f32 0.5, %v388_v43  ;;  %v475_v42 = vpop.permute.xlu0 %474 }
 0x151   :  { %v1081_v44 = vpop.eup %1080  ;;  %963 = vmatprep.subr.bf16.mxu1 %v1116_v4 }
 0x152   :  { %v389_v45 = vadd.f32 1.0, %v1081_v44 }
 0x154   :  { %v402_v47 = vmul.f32 0.5, %v389_v45 }
 0x155   :  { %v1083_v48 = vpop.eup %1082 }
 0x156   :  { %v390_v49 = vadd.f32 1.0, %v1083_v48  ;;  %v422_v50 = vpack.c.bf16 %v402_v47, %v401_v46 }
 0x158   :  { %964 = vmatpush3.bf16.msra.mxu1 %v422_v50  ;;  %v403_v51 = vmul.f32 0.5, %v390_v49 }
 0x159   :  { %965 = vmatprep.subr.bf16.mxu1 %v1116_v4 }
 0x15a   :  { %v423_v52 = vpack.c.bf16 %v403_v51, %v403_v51 }
 0x15c   :  { %v559_v53 = vsel %vm557_vm3, %v423_v52, 0 }
 0x15d   :  { %966 = vmatpush3.bf16.msra.mxu1 %v559_v53  ;;  %v480_v53 = vpop.permute.xlu1 %479 }
 0x15e   :  { %995 = vmatprep.subr.bf16.mxu1 %v1116_v4 }
 0x160   :  { %968 = vmatmul.mubr.msk.bf16.vlgmr.msra.gmra.mrb[0].mxu1 %vm535_vm4, %v1051_v54 }
 0x161   :  { %971 = vmatprep.mubr.msk.bf16.mxu1 %vm1115_vm2, %v1116_v4 }
 0x168   :  { %972 = vmatmul.mubr.msk.bf16.gmra.mrb[4].mxu1 %vm535_vm4, %v1052_v55 }
 0x169   :  { %975 = vmatprep.mubr.msk.bf16.mxu1 %vm1115_vm2, %v1116_v4 }
 0x170   :  { %976 = vmatmul.mubr.msk.bf16.gmra.mrb[8].mxu1 %vm535_vm4, %v1053_v56 }
 0x171   :  { %979 = vmatprep.mubr.msk.bf16.mxu1 %vm1115_vm2, %v1116_v4 }
 0x178   :  { %980 = vmatmul.mubr.msk.bf16.gmra.mrb[12].mxu1 %vm535_vm4, %v1054_v57 }
 0x179   :  { %983 = vmatprep.mubr.msk.bf16.mxu1 %vm1115_vm2, %v1116_v4 }
 0x180   :  { %984 = vmatmul.mubr.msk.bf16.gmra.mrb[16].mxu1 %vm535_vm4, %v1055_v58 }
 0x181   :  { %987 = vmatprep.mubr.msk.bf16.mxu1 %vm1115_vm2, %v1116_v4 }
 0x188   :  { %988 = vmatmul.mubr.msk.bf16.gmra.mrb[20].mxu1 %vm535_vm4, %v1056_v59  ;;  %v485_v59 = vpop.permute.xlu0 %484 }
 0x189   :  { %991 = vmatprep.mubr.msk.bf16.mxu1 %vm1115_vm2, %v1116_v4 }
 0x190   :  { %992 = vmatmul.mubr.msk.bf16.gmra.mrb[24].mxu1 %vm535_vm4, %v1057_v60 }
 0x191   :  { %1009 = vmatprep.mubr.msk.bf16.mxu1 %vm1115_vm2, %v1116_v4 }
 0x233   :  { %v595_v62 = vpop.f32.mrb[0].mxu1 }
 0x234   :  { %v596_v63 = vadd.f32 %v595_v62, %v440_v61  ;;  %v969_v0 = vpop.f32.mrb[1].mxu1 }
 0x235   :  { %v598_v2 = vpop.f32.mrb[2].mxu1 }
 0x236   :  { %v649_v3 = vmul.f32 0.5, %v596_v63  ;;  %v599_v5 = vadd.f32 %v598_v2, %v445_v1  ;;  %v970_v6 = vpop.f32.mrb[3].mxu1 }
 0x238   :  { %1084 = vtanh.f32 %v649_v3  ;;  %v650_v7 = vmul.f32 0.5, %v599_v5 }
 0x23a   :  { %1086 = vtanh.f32 %v650_v7  ;;  %v490_v7 = vpop.permute.xlu1 %489 }
 0x23b   :  { %v603_v9 = vpop.f32.mrb[4].mxu1 }
 0x23c   :  { %v604_v10 = vadd.f32 %v603_v9, %v450_v8  ;;  %v973_v11 = vpop.f32.mrb[5].mxu1 }
 0x23d   :  { %v606_v13 = vpop.f32.mrb[6].mxu1 }
 0x23e   :  { %v651_v14 = vmul.f32 0.5, %v604_v10  ;;  %v607_v15 = vadd.f32 %v606_v13, %v455_v12  ;;  %v974_v16 = vpop.f32.mrb[7].mxu1  ;;  %v495_v13 = vpop.permute.xlu0 %494 }
 0x240   :  { %1088 = vtanh.f32 %v651_v14  ;;  %v652_v17 = vmul.f32 0.5, %v607_v15 }
 0x242   :  { %v1085_v18 = vpop.eup %1084  ;;  %1090 = vtanh.f32 %v652_v17 }
 0x243   :  { %v675_v20 = vadd.f32 1.0, %v1085_v18  ;;  %v611_v21 = vpop.f32.mrb[8].mxu1 }
 0x244   :  { %v1087_v22 = vpop.eup %1086  ;;  %v612_v23 = vadd.f32 %v611_v21, %v460_v19  ;;  %v977_v24 = vpop.f32.mrb[9].mxu1 }
 0x245   :  { %v676_v26 = vadd.f32 1.0, %v1087_v22  ;;  %v614_v27 = vpop.f32.mrb[10].mxu1  ;;  %v688_v31 = vmul.f32 0.5, %v675_v20  ;;  %v500_v24 = vpop.permute.xlu1 %499 }
 0x246   :  { %v653_v28 = vmul.f32 0.5, %v612_v23  ;;  %v615_v29 = vadd.f32 %v614_v27, %v465_v25  ;;  %v978_v30 = vpop.f32.mrb[11].mxu1 }
 0x247   :  { %v689_v32 = vmul.f32 0.5, %v676_v26 }
 0x248   :  { %1092 = vtanh.f32 %v653_v28  ;;  %v654_v33 = vmul.f32 0.5, %v615_v29 }
 0x249   :  { %v702_v34 = vpack.c.bf16 %v689_v32, %v688_v31 }
 0x24a   :  { %v1089_v35 = vpop.eup %1088  ;;  %1094 = vtanh.f32 %v654_v33 }
 0x24b   :  { %v677_v37 = vadd.f32 1.0, %v1089_v35  ;;  %v619_v38 = vpop.f32.mrb[12].mxu1  ;;  %996 = vmatpush3.bf16.msra.mxu1 %v702_v34 }
 0x24c   :  { %v1091_v39 = vpop.eup %1090  ;;  %v620_v40 = vadd.f32 %v619_v38, %v470_v36  ;;  %v981_v41 = vpop.f32.mrb[13].mxu1  ;;  %997 = vmatprep.subr.bf16.mxu1 %v1116_v4 }
 0x24d   :  { %v678_v43 = vadd.f32 1.0, %v1091_v39  ;;  %v622_v44 = vpop.f32.mrb[14].mxu1  ;;  %v690_v48 = vmul.f32 0.5, %v677_v37 }
 0x24e   :  { %v655_v45 = vmul.f32 0.5, %v620_v40  ;;  %v623_v46 = vadd.f32 %v622_v44, %v475_v42  ;;  %v982_v47 = vpop.f32.mrb[15].mxu1 }
 0x24f   :  { %v691_v49 = vmul.f32 0.5, %v678_v43 }
 0x250   :  { %1096 = vtanh.f32 %v655_v45  ;;  %v656_v50 = vmul.f32 0.5, %v623_v46 }
 0x251   :  { %v703_v51 = vpack.c.bf16 %v691_v49, %v690_v48  ;;  %v701_v49 = vld [vmem:[%s1470_s5] sm:$0x3] }
 0x252   :  { %v1093_v52 = vpop.eup %1092  ;;  %1098 = vtanh.f32 %v656_v50  ;;  %v713_v50 = vpop.permute.xlu0 %712 }
 0x253   :  { %v679_v54 = vadd.f32 1.0, %v1093_v52  ;;  %v627_v55 = vpop.f32.mrb[16].mxu1  ;;  %998 = vmatpush3.bf16.msra.mxu1 %v703_v51 }
 0x254   :  { %v1095_v56 = vpop.eup %1094  ;;  %v628_v57 = vadd.f32 %v627_v55, %v480_v53  ;;  %v985_v58 = vpop.f32.mrb[17].mxu1  ;;  %999 = vmatprep.subr.bf16.mxu1 %v1116_v4 }
 0x255   :  { %v680_v60 = vadd.f32 1.0, %v1095_v56  ;;  %v630_v61 = vpop.f32.mrb[18].mxu1  ;;  %v692_v1 = vmul.f32 0.5, %v679_v54 }
 0x256   :  { %v657_v62 = vmul.f32 0.5, %v628_v57  ;;  %v631_v63 = vadd.f32 %v630_v61, %v485_v59  ;;  %v986_v0 = vpop.f32.mrb[19].mxu1 }
 0x257   :  { %v693_v2 = vmul.f32 0.5, %v680_v60 }
 0x258   :  { %1100 = vtanh.f32 %v657_v62  ;;  %v658_v3 = vmul.f32 0.5, %v631_v63 }
 0x259   :  { %v704_v5 = vpack.c.bf16 %v693_v2, %v692_v1 }
 0x25a   :  { %v1097_v6 = vpop.eup %1096  ;;  %1102 = vtanh.f32 %v658_v3 }
 0x25b   :  { %v681_v8 = vadd.f32 1.0, %v1097_v6  ;;  %v635_v9 = vpop.f32.mrb[20].mxu1  ;;  %1000 = vmatpush3.bf16.msra.mxu1 %v704_v5 }
 0x25c   :  { %v1099_v10 = vpop.eup %1098  ;;  %v636_v11 = vadd.f32 %v635_v9, %v490_v7  ;;  %v989_v12 = vpop.f32.mrb[21].mxu1  ;;  %1001 = vmatprep.subr.bf16.mxu1 %v1116_v4 }
 0x25d   :  { %v682_v14 = vadd.f32 1.0, %v1099_v10  ;;  %v638_v15 = vpop.f32.mrb[22].mxu1  ;;  %v694_v19 = vmul.f32 0.5, %v681_v8 }
 0x25e   :  { %v659_v16 = vmul.f32 0.5, %v636_v11  ;;  %v639_v17 = vadd.f32 %v638_v15, %v495_v13  ;;  %v990_v18 = vpop.f32.mrb[23].mxu1 }
 0x25f   :  { %v695_v20 = vmul.f32 0.5, %v682_v14 }
 0x260   :  { %1104 = vtanh.f32 %v659_v16  ;;  %v660_v21 = vmul.f32 0.5, %v639_v17 }
 0x261   :  { %v705_v22 = vpack.c.bf16 %v695_v20, %v694_v19 }
 0x262   :  { %v1101_v23 = vpop.eup %1100  ;;  %1106 = vtanh.f32 %v660_v21 }
 0x263   :  { %v683_v25 = vadd.f32 1.0, %v1101_v23  ;;  %v643_v26 = vpop.f32.mrb[24].mxu1  ;;  %1002 = vmatpush3.bf16.msra.mxu1 %v705_v22 }
 0x264   :  { %v1103_v27 = vpop.eup %1102  ;;  %v644_v28 = vadd.f32 %v643_v26, %v500_v24  ;;  %v993_v29 = vpop.f32.mrb[25].mxu1  ;;  %1003 = vmatprep.subr.bf16.mxu1 %v1116_v4 }
 0x265   :  { %v684_v30 = vadd.f32 1.0, %v1103_v27  ;;  %v646_v31 = vpop.f32.mrb[26].mxu1  ;;  %v696_v34 = vmul.f32 0.5, %v683_v25 }
 0x266   :  { %v661_v32 = vmul.f32 0.5, %v644_v28  ;;  %v994_v33 = vpop.f32.mrb[27].mxu1 }
 0x267   :  { %v697_v35 = vmul.f32 0.5, %v684_v30 }
 0x268   :  { %1108 = vtanh.f32 %v661_v32 }
 0x269   :  { %v706_v36 = vpack.c.bf16 %v697_v35, %v696_v34 }
 0x26a   :  { %v1105_v37 = vpop.eup %1104 }
 0x26b   :  { %v685_v38 = vadd.f32 1.0, %v1105_v37  ;;  %1004 = vmatpush3.bf16.msra.mxu1 %v706_v36 }
 0x26c   :  { %v1107_v39 = vpop.eup %1106  ;;  %1005 = vmatprep.subr.bf16.mxu1 %v1116_v4 }
 0x26d   :  { %v686_v40 = vadd.f32 1.0, %v1107_v39  ;;  %v698_v41 = vmul.f32 0.5, %v685_v38 }
 0x26f   :  { %v699_v42 = vmul.f32 0.5, %v686_v40 }
 0x271   :  { %v707_v43 = vpack.c.bf16 %v699_v42, %v698_v41 }
 0x272   :  { %v1109_v44 = vpop.eup %1108 }
 0x273   :  { %v687_v45 = vadd.f32 1.0, %v1109_v44  ;;  %1006 = vmatpush3.bf16.msra.mxu1 %v707_v43 }
 0x274   :  { %1007 = vmatprep.subr.bf16.mxu1 %v1116_v4 }
 0x275   :  { %v700_v46 = vmul.f32 0.5, %v687_v45 }
 0x277   :  { %v708_v47 = vpack.c.bf16 %v700_v46, %v700_v46 }
 0x279   :  { %v719_v48 = vsel %vm557_vm3, %v708_v47, 0 }
 0x27a   :  { %1008 = vmatpush3.bf16.msra.mxu1 %v719_v48 }
 0x27d   :  { %1010 = vmatmul.mubr.msk.bf16.vlgmr.msra.gmra.mrb[28].mxu1 %vm535_vm4, %v701_v49 }
 0x350   :  { %v755_v51 = vpop.f32.mrb[28].mxu1 }
 0x351   :  { %v756_v52 = vadd.f32 %v755_v51, %v713_v50  ;;  %v1011_v53 = vpop.f32.mrb[29].mxu1 }
 0x352   :  { %v758_v54 = vpop.f32.mrb[30].mxu1 }
 0x353   :  { %v762_v55 = vsel %vm761_vm5, %v756_v52, -inf  ;;  %v1012_v4 = vpop.f32.mrb[31].mxu1 }
 0x354   :  { %v763_v56 = vrot.slane %v762_v55, 4 }
 0x356   :  { %v764_v57 = vmax.f32 %v762_v55, %v763_v56 }
 0x358   :  { %v765_v58 = vrot.slane %v764_v57, 2 }
 0x35a   :  { %v766_v59 = vmax.f32 %v764_v57, %v765_v58 }
 0x35c   :  { %v767_v60 = vrot.slane %v766_v59, 1 }
 0x35e   :  { %v768_v61 = vmax.f32 %v766_v59, %v767_v60 }
 0x360   :  { %v769_v62 = vsub.f32 %v756_v52, %v768_v61 }
 0x362   :  { %v770_v63 = vmul.f32 1.442695, %v769_v62 }
 0x364   :  { %1110 = vpow2.f32 %v770_v63 }
 0x36e   :  { %v1111_v0 = vpop.eup %1110 }
 0x36f   :  { %v772_v1 = vsel %vm761_vm5, %v1111_v0, 0.0 }
 0x370   :  { %v773_v2 = vrot.slane %v772_v1, 4 }
 0x372   :  { %v774_v3 = vadd.f32 %v773_v2, %v772_v1 }
 0x374   :  { %v775_v5 = vrot.slane %v774_v3, 2 }
 0x376   :  { %v776_v6 = vadd.f32 %v775_v5, %v774_v3 }
 0x378   :  { %v777_v7 = vrot.slane %v776_v6, 1 }
 0x37a   :  { %v778_v8 = vadd.f32 %v777_v7, %v776_v6 }
 0x37c   :  { %1112 = vlog2.f32 %v778_v8 }
 0x386   :  { %v1113_v9 = vpop.eup %1112 }
 0x387   :  { %v780_v10 = vmul.f32 0.6931472, %v1113_v9 }
 0x389   :  { %v781_v11 = vsub.f32 %v769_v62, %v780_v10 }
 0x38b   :  { %782 = vst [vmem:[%s1471_s7] sm:$0x7] %v781_v11 }

</bundles_post_ra>
